<compile_context>
chip_gen: v5e
topology: v5e:2x2
jax: 0.10.0
libtpu: 0.0.40
codegen_flags: <defaults>
</compile_context>

<pallas_src>
import jax
import jax.numpy as jnp
from jax.experimental import pallas as pl
from jax.experimental.pallas import tpu as pltpu


def _gate_kernel(x_ref, g_ref, o_ref):
    # x_ref / o_ref: (TN, C, TL) tile of the (N, C, H*W) view.
    # g_ref:         (C, 1) per-channel gate value. Its BlockSpec index_map is
    #                constant, so it is DMA'd once and stays resident in VMEM;
    #                the VPU broadcasts it over batch and lanes here.
    o_ref[...] = x_ref[...] * g_ref[...][None, :, :]


def _gated_multiply(x3d, g_col, tile_bytes=2 * 1024 * 1024):
    """Broadcast-multiply x3d (N, C, L) by per-channel gate g_col (C, 1)."""
    N, C, L = x3d.shape
    itemsize = jnp.dtype(x3d.dtype).itemsize

    # Lane tile: keep the full (lane-dense) spatial extent unless a single
    # image's C x L slab alone blows the budget and L is 128-tileable.
    if C * L * itemsize > tile_bytes and L % 128 == 0:
        TL = min(L, max(128, (tile_bytes // (C * itemsize)) // 128 * 128))
    else:
        TL = L
    # Batch tile: grow the block over the batch axis up to the VMEM budget.
    TN = max(1, min(N, tile_bytes // (C * TL * itemsize)))

    grid = (pl.cdiv(N, TN), pl.cdiv(L, TL))

    return pl.pallas_call(
        _gate_kernel,
        out_shape=jax.ShapeDtypeStruct((N, C, L), x3d.dtype),
        grid=grid,
        in_specs=[
            pl.BlockSpec((TN, C, TL), lambda i, j: (i, 0, j)),
            # Constant block index => gate DMA'd once, resident for the whole grid.
            pl.BlockSpec((C, 1), lambda i, j: (0, 0)),
        ],
        out_specs=pl.BlockSpec((TN, C, TL), lambda i, j: (i, 0, j)),
        compiler_params=pltpu.CompilerParams(
            dimension_semantics=("parallel", "parallel"),
            vmem_limit_bytes=32 * 1024 * 1024,
        ),
    )(x3d, g_col)


def differentiable_gate_with_prefix_forward(x, gates, prefix_gate, sparsity,
                                            training=True):
    """Forward of DifferentiableGateWithPrefix.

    x:           (N, C, H, W) NCHW input
    gates:       (C,) learnable gate parameters of this module
    prefix_gate: (C,) per-channel gate value produced by the prefix module
    """
    N, C, H, W = x.shape
    ngates = gates.shape[0]
    assert ngates == C and prefix_gate.shape == (C,), "one gate per channel"

    # --- tiny parameter glue, stays in plain JAX ---------------------------
    k_keep = max(1, int(ngates * (1.0 - sparsity)))
    thresh = jnp.sort(gates)[::-1][k_keep - 1]
    # Note: ties at the threshold keep >k channels (same as `>=` thresholding).
    binary = (gates >= thresh).astype(gates.dtype)
    # Straight-through estimator: value == binary, gradient path through gates.
    gate_val = binary + gates - jax.lax.stop_gradient(gates)
    combined = (gate_val * prefix_gate).astype(x.dtype).reshape(C, 1)

    # --- Pallas hot path on the contiguous (N, C, H*W) view ----------------
    out3d = _gated_multiply(x.reshape(N, C, H * W), combined)
    return out3d.reshape(N, C, H, W)


if __name__ == "__main__":
    key = jax.random.PRNGKey(0)
    k_gate, k_prefix, k_x = jax.random.split(key, 3)

    # Module config: ngates == channels, sparsity = 0.5
    N, C, H, W = 2, 4, 16, 16
    sparsity = 0.5

    gates = jax.random.uniform(k_gate, (C,), dtype=jnp.float32)        # nn.init.uniform_
    prefix_gate = jax.random.uniform(k_prefix, (C,), dtype=jnp.float32)
    x = jax.random.normal(k_x, (N, C, H, W), dtype=jnp.float32)

    out = differentiable_gate_with_prefix_forward(x, gates, prefix_gate, sparsity,
                                                  training=True)
    out = jax.block_until_ready(out)

    # Pure-JAX reference: forward value = input * (binary mask * prefix gate) per channel
    k_keep = max(1, int(C * (1.0 - sparsity)))
    thresh = jnp.sort(gates)[::-1][k_keep - 1]
    binary = (gates >= thresh).astype(x.dtype)
    ref = x * (binary * prefix_gate).reshape(1, C, 1, 1)

    assert out.shape == x.shape and out.dtype == x.dtype
    assert jnp.allclose(out, ref, atol=1e-6, rtol=1e-6)
    print("KERNEL_OK")
</pallas_src>

<mosaic_0001>
module attributes {stable_mosaic.version = 11 : i64} {
  func.func @_gate_kernel(%arg0: i32, %arg1: i32, %arg2: memref<2x4x256xf32, #tpu.memory_space<vmem>>, %arg3: memref<4x1xf32, #tpu.memory_space<vmem>>, %arg4: memref<2x4x256xf32, #tpu.memory_space<vmem>>) attributes {dimension_semantics = [#tpu.dimension_semantics<parallel>, #tpu.dimension_semantics<parallel>], iteration_bounds = array<i64: 1, 1>, scalar_prefetch = 0 : i64, scratch_operands = 0 : i64, tpu.core_type = #tpu.core_type<tc>, window_params = [{transform_indices = @transform_0, window_bounds = array<i64: 2, 4, 256>}, {pipeline_mode = #tpu.pipeline_mode<synchronous>, transform_indices = @transform_1, window_bounds = array<i64: 4, 1>}, {transform_indices = @transform_2, window_bounds = array<i64: 2, 4, 256>}]} {
    %c0 = arith.constant 0 : index
    %c0_0 = arith.constant 0 : index
    %c0_1 = arith.constant 0 : index
    %0 = vector.load %arg2[%c0, %c0_0, %c0_1] : memref<2x4x256xf32, #tpu.memory_space<vmem>>, vector<2x4x256xf32>
    %c0_2 = arith.constant 0 : index
    %c0_3 = arith.constant 0 : index
    %1 = vector.load %arg3[%c0_2, %c0_3] : memref<4x1xf32, #tpu.memory_space<vmem>>, vector<4x1xf32>
    %2 = vector.shape_cast %1 : vector<4x1xf32> to vector<1x4x1xf32>
    %3 = vector.broadcast %2 : vector<1x4x1xf32> to vector<2x4x256xf32>
    %4 = arith.mulf %0, %3 : vector<2x4x256xf32>
    %c0_4 = arith.constant 0 : index
    %c0_5 = arith.constant 0 : index
    %c0_6 = arith.constant 0 : index
    %5 = vector.load %arg4[%c0_4, %c0_5, %c0_6] : memref<2x4x256xf32, #tpu.memory_space<vmem>>, vector<2x4x256xf32>
    tpu.vector_store %arg4[%c0_4, %c0_5, %c0_6], %4 {strides = array<i32>} : memref<2x4x256xf32, #tpu.memory_space<vmem>>, vector<2x4x256xf32>,
    return
  }
  func.func @transform_0(%arg0: i32, %arg1: i32) -> (i32, i32, i32) {
    %c0_i32 = arith.constant 0 : i32
    %c0_i32_0 = arith.constant 0 : i32
    return %arg0, %c0_i32, %arg1 : i32, i32, i32
  }
  func.func @transform_1(%arg0: i32, %arg1: i32) -> (i32, i32) {
    %c0_i32 = arith.constant 0 : i32
    %c0_i32_0 = arith.constant 0 : i32
    %c0_i32_1 = arith.constant 0 : i32
    return %c0_i32, %c0_i32_0 : i32, i32
  }
  func.func @transform_2(%arg0: i32, %arg1: i32) -> (i32, i32, i32) {
    %c0_i32 = arith.constant 0 : i32
    %c0_i32_0 = arith.constant 0 : i32
    return %arg0, %c0_i32, %arg1 : i32, i32, i32
  }
}

</mosaic_0001>

<bundles_post_ra>
// kernel: tpu_custom_call.1
= control target key start
LH: loop header
LB: loop body
LE: loop exit
PB: predicated region body
PF: predicated region fallthrough
CT: control target
= control target key end

     0   :  { %7 = vsyncpa [#allocation3], 0  ;;  %s152_s0 = inlined_call_operand.hbm [shape: f32[2,4,256], index: 0, kind: input, shape index: {}]   ;;  %s153_s1 = inlined_call_operand.vmem [shape: f32[4,1], index: 1, kind: input, shape index: {}]   ;;  %s154_s2 = inlined_call_operand.hbm [shape: f32[2,4,256], index: 2, kind: output, shape index: {}]  }
   0x1   :  { %8 = vsyncpa [#allocation4], 0  ;;  %s13_s11 = sshll.u32 %s152_s0, 4  ;;  %s122_s12 = smov [#allocation2]   ;;  %s14_s11 = int_to_ptr.hbm [resolvable:$true] %s13_s11 }
   0x2   :  { %s15_s13 = sshll.u32 %s122_s12, 4  ;;  %s123_s14 = smov 128   ;;  %s16_s13 = int_to_ptr.vmem [resolvable:$true] %s15_s13 }
   0x3   :  { %s124_s15 = smov 8  }
   0x4   :  { %21 = dma.hbm_to_vmem [thread:$0]  %s14_s11, 256, %s16_s13, [#allocation3], %s123_s14, %s123_s14, %s124_s15  }
   0x5   :  { %118 = dma.done.wait [#allocation3], 256  }
   0x6   :  { %119 = vsyncadd [#allocation3], 4294967040  ;;  %v125_v0 = vmov 0   ;;  %v30_v1 = vld [vmem:[%s153_s1] sm:$0xf]  ;;  %v29_v7 = vld [vmem:[#allocation2 + $0x8] sm:$0xff] }
   0x7   :  { %69 = vset.pattern.permute.xlu0 %v125_v0  ;;  %v126_v2 = vmov 839922192   ;;  %v28_v6 = vld [vmem:[#allocation2] sm:$0xff]  ;;  %s127_s0 = smov [#allocation5]   ;;  %s50_s21 = sshll.u32 %s154_s2, 4  ;;  %s51_s21 = int_to_ptr.hbm [resolvable:$true] %s50_s21 }
   0x8   :  { %33 = vperm.xlu0 %69, %v30_v1   ;;  %v36_v3 = vunpack.c.l.s4 %v126_v2  ;;  %s48_s18 = sshll.u32 %s127_s0, 4  ;;  %s49_s18 = int_to_ptr.vmem [resolvable:$true] %s48_s18 }
   0xa   :  { %v37_v4 = vunpack.c.0.s8 %v36_v3 }
  0x7a   :  { %v34_v5 = vpop.permute.xlu0 %33 }
  0x7b   :  { %v38_v8 = vperm.slane %v34_v5, %v37_v4 }
  0x7d   :  { %v40_v9 = vmul.f32 %v38_v8, %v28_v6  ;;  %v41_v10 = vmul.f32 %v38_v8, %v29_v7 }
  0x7f   :  { %42 = vst [vmem:[#allocation5] sm:$0xff] %v40_v9 }
  0x80   :  { %43 = vst [vmem:[#allocation5 + $0x8] sm:$0xff] %v41_v10 }
  0x81   :  { %56 = dma.vmem_to_hbm [thread:$0]  %s49_s18, 256, %s51_s21, [#allocation4], %s123_s14, %s123_s14, %s124_s15  }
  0x82   :  { %120 = dma.done.wait [#allocation4], 256  }
  0x83   :  { %121 = vsyncadd [#allocation4], 4294967040 }
  0x84   :  { %61 = vsyncpa [#allocation3], 1 }
  0x85   :  { %62 = vsyncpa [#allocation4], 1 }

</bundles_post_ra>
